<compile_context>
chip_gen: v6e
topology: v6e:2x2x1
jax: 0.10.0
libtpu: 0.0.40
codegen_flags: <defaults>
</compile_context>

<pallas_src>
import jax
import jax.numpy as jnp
from jax import lax
from jax.experimental import pallas as pl
from jax.experimental.pallas import tpu as pltpu


def bridge_up_kernel(patch_ref, wconv_ref, bconv_ref, wdec_ref, bdec_ref, out_ref):
    # patch_ref: (1, 9*Cin, HW)   im2col patches, spatial on lanes
    # wconv_ref: (Cin, 9*Cin)     fused 3x3 conv weight
    # bconv_ref: (Cin, 1)
    # wdec_ref : (4*Cout, Cin)    fused 2x2 deconv weight (4 offsets stacked on M)
    # bdec_ref : (4*Cout, 1)
    # out_ref  : (1, 4*Cout, HW)  row m = (i*2+j)*Cout + co -> output pixel (2h+i, 2w+j)

    # --- 3x3 conv as a single MXU push: (Cin, 9*Cin) @ (9*Cin, HW) ---
    h = jnp.dot(wconv_ref[...], patch_ref[0],
                preferred_element_type=jnp.float32)
    # bias + ReLU (h is (Cin, HW): ~2 vregs, no spill pressure)
    h = jnp.maximum(h + bconv_ref[...], 0.0)

    # --- 2x2 stride-2 transpose conv, all 4 taps fused: (4*Cout, Cin) @ (Cin, HW) ---
    y = jnp.dot(wdec_ref[...], h, preferred_element_type=jnp.float32)
    # single lane-dense store (last dim = HW = 256, unmasked vst)
    out_ref[0] = y + bdec_ref[...]


def bridge_up_forward(x_nchw, w_conv, b_conv, w_deconv, b_deconv):
    """x_nchw: (B, Cin, H, W) float32 -> (B, Cout, 2H, 2W) float32."""
    B, Cin, H, W = x_nchw.shape
    Cout = w_deconv.shape[1]
    HW = H * W

    # ---- glue: im2col patches with spatial on the last (lane) axis ----
    x_pad = jnp.pad(x_nchw, ((0, 0), (0, 0), (1, 1), (1, 1)))  # (B, Cin, H+2, W+2)
    taps = []
    for dy in range(3):
        for dx in range(3):
            taps.append(x_pad[:, :, dy:dy + H, dx:dx + W].reshape(B, Cin, HW))
    patches = jnp.concatenate(taps, axis=1)                    # (B, 9*Cin, HW)

    # ---- glue: fused weight / bias layouts ----
    # PyTorch Conv2d weight (Co=Cin, Ci, 3, 3) -> (Cin, 9*Cin), k = (dy*3+dx)*Cin + ci
    wconv_mat = jnp.transpose(w_conv, (0, 2, 3, 1)).reshape(Cin, 9 * Cin)
    bconv_col = b_conv.reshape(Cin, 1)
    # PyTorch ConvTranspose2d weight (Ci, Co, 2, 2) -> (4*Cout, Cin),
    # row m = (i*2+j)*Cout + co
    wdec_mat = jnp.transpose(w_deconv, (2, 3, 1, 0)).reshape(4 * Cout, Cin)
    bdec_col = jnp.tile(b_deconv, 4).reshape(4 * Cout, 1)

    out = pl.pallas_call(
        bridge_up_kernel,
        out_shape=jax.ShapeDtypeStruct((B, 4 * Cout, HW), jnp.float32),
        grid=(B,),
        in_specs=[
            pl.BlockSpec((1, 9 * Cin, HW), lambda b: (b, 0, 0)),
            pl.BlockSpec((Cin, 9 * Cin), lambda b: (0, 0)),
            pl.BlockSpec((Cin, 1), lambda b: (0, 0)),
            pl.BlockSpec((4 * Cout, Cin), lambda b: (0, 0)),
            pl.BlockSpec((4 * Cout, 1), lambda b: (0, 0)),
        ],
        out_specs=pl.BlockSpec((1, 4 * Cout, HW), lambda b: (b, 0, 0)),
        compiler_params=pltpu.CompilerParams(dimension_semantics=("parallel",)),
    )(patches, wconv_mat, bconv_col, wdec_mat, bdec_col)

    # ---- glue: depth-to-space -> NCHW ----
    # out[b, (i*2+j)*Cout + co, h*W + w] -> y[b, co, 2h+i, 2w+j]
    out = out.reshape(B, 2, 2, Cout, H, W)
    out = jnp.transpose(out, (0, 3, 4, 1, 5, 2)).reshape(B, Cout, 2 * H, 2 * W)
    return out


def reference_forward(x, w_conv, b_conv, w_deconv, b_deconv):
    """Pure-JAX reference using lax.conv_general_dilated (NCHW, like PyTorch)."""
    dn = ("NCHW", "OIHW", "NCHW")
    h = lax.conv_general_dilated(x, w_conv, window_strides=(1, 1),
                                 padding=[(1, 1), (1, 1)], dimension_numbers=dn)
    h = jnp.maximum(h + b_conv.reshape(1, -1, 1, 1), 0.0)
    # ConvTranspose(k=2, s=2, p=0) == conv with lhs_dilation=2, pad k-1, flipped kernel
    w_t = jnp.flip(jnp.transpose(w_deconv, (1, 0, 2, 3)), axis=(2, 3))
    y = lax.conv_general_dilated(h, w_t, window_strides=(1, 1),
                                 padding=[(1, 1), (1, 1)], lhs_dilation=(2, 2),
                                 dimension_numbers=dn)
    return y + b_deconv.reshape(1, -1, 1, 1)


if __name__ == "__main__":
    B, Cin, Cout, H, W = 2, 4, 8, 16, 16

    key = jax.random.PRNGKey(0)
    k1, k2, k3, k4, k5 = jax.random.split(key, 5)

    x = jax.random.normal(k1, (B, Cin, H, W), dtype=jnp.float32)

    bound_c = 1.0 / jnp.sqrt(Cin * 3 * 3)
    w_conv = jax.random.uniform(k2, (Cin, Cin, 3, 3), jnp.float32, -bound_c, bound_c)
    b_conv = jax.random.uniform(k3, (Cin,), jnp.float32, -bound_c, bound_c)

    bound_d = 1.0 / jnp.sqrt(Cin * 2 * 2)
    w_deconv = jax.random.uniform(k4, (Cin, Cout, 2, 2), jnp.float32, -bound_d, bound_d)
    b_deconv = jax.random.uniform(k5, (Cout,), jnp.float32, -bound_d, bound_d)

    out = bridge_up_forward(x, w_conv, b_conv, w_deconv, b_deconv)
    out = jax.block_until_ready(out)

    ref = reference_forward(x, w_conv, b_conv, w_deconv, b_deconv)
    assert out.shape == (B, Cout, 2 * H, 2 * W), out.shape
    assert jnp.allclose(out, ref, atol=1e-4, rtol=1e-4), float(jnp.max(jnp.abs(out - ref)))

    print("KERNEL_OK")
</pallas_src>

<mosaic_0001>
module attributes {stable_mosaic.version = 11 : i64} {
  func.func @bridge_up_kernel(%arg0: i32, %arg1: memref<1x36x256xf32, #tpu.memory_space<vmem>>, %arg2: memref<4x36xf32, #tpu.memory_space<vmem>>, %arg3: memref<4x1xf32, #tpu.memory_space<vmem>>, %arg4: memref<32x4xf32, #tpu.memory_space<vmem>>, %arg5: memref<32x1xf32, #tpu.memory_space<vmem>>, %arg6: memref<1x32x256xf32, #tpu.memory_space<vmem>>) attributes {dimension_semantics = [#tpu.dimension_semantics<parallel>], iteration_bounds = array<i64: 2>, scalar_prefetch = 0 : i64, scratch_operands = 0 : i64, tpu.core_type = #tpu.core_type<tc>, window_params = [{transform_indices = @transform_0, window_bounds = array<i64: 1, 36, 256>}, {pipeline_mode = #tpu.pipeline_mode<synchronous>, transform_indices = @transform_1, window_bounds = array<i64: 4, 36>}, {pipeline_mode = #tpu.pipeline_mode<synchronous>, transform_indices = @transform_2, window_bounds = array<i64: 4, 1>}, {pipeline_mode = #tpu.pipeline_mode<synchronous>, transform_indices = @transform_3, window_bounds = array<i64: 32, 4>}, {pipeline_mode = #tpu.pipeline_mode<synchronous>, transform_indices = @transform_4, window_bounds = array<i64: 32, 1>}, {transform_indices = @transform_5, window_bounds = array<i64: 1, 32, 256>}]} {
    %c0 = arith.constant 0 : index
    %c0_0 = arith.constant 0 : index
    %0 = vector.load %arg2[%c0, %c0_0] : memref<4x36xf32, #tpu.memory_space<vmem>>, vector<4x36xf32>
    %c0_1 = arith.constant 0 : index
    %c0_2 = arith.constant 0 : index
    %c0_3 = arith.constant 0 : index
    %1 = vector.load %arg1[%c0_1, %c0_2, %c0_3] : memref<1x36x256xf32, #tpu.memory_space<vmem>>, vector<1x36x256xf32>
    %2 = vector.shape_cast %1 : vector<1x36x256xf32> to vector<36x256xf32>
    %cst = arith.constant dense<0.000000e+00> : vector<4x256xf32>
    %3 = tpu.matmul %0, %2, %cst {dimension_numbers = #tpu.dot_dimension_numbers<[1], [0], [0], [1], [0, 0, 1, 1], [], []>} : vector<4x36xf32>, vector<36x256xf32>, vector<4x256xf32> -> vector<4x256xf32>
    %c0_4 = arith.constant 0 : index
    %c0_5 = arith.constant 0 : index
    %4 = vector.load %arg3[%c0_4, %c0_5] : memref<4x1xf32, #tpu.memory_space<vmem>>, vector<4x1xf32>
    %5 = vector.broadcast %4 : vector<4x1xf32> to vector<4x256xf32>
    %6 = arith.addf %3, %5 : vector<4x256xf32>
    %cst_6 = arith.constant 0.000000e+00 : f32
    %7 = vector.broadcast %cst_6 : f32 to vector<4x256xf32>
    %8 = arith.maximumf %6, %7 : vector<4x256xf32>
    %c0_7 = arith.constant 0 : index
    %c0_8 = arith.constant 0 : index
    %9 = vector.load %arg4[%c0_7, %c0_8] : memref<32x4xf32, #tpu.memory_space<vmem>>, vector<32x4xf32>
    %cst_9 = arith.constant dense<0.000000e+00> : vector<32x256xf32>
    %10 = tpu.matmul %9, %8, %cst_9 {dimension_numbers = #tpu.dot_dimension_numbers<[1], [0], [0], [1], [0, 0, 1, 1], [], []>} : vector<32x4xf32>, vector<4x256xf32>, vector<32x256xf32> -> vector<32x256xf32>
    %c0_10 = arith.constant 0 : index
    %c0_11 = arith.constant 0 : index
    %11 = vector.load %arg5[%c0_10, %c0_11] : memref<32x1xf32, #tpu.memory_space<vmem>>, vector<32x1xf32>
    %12 = vector.broadcast %11 : vector<32x1xf32> to vector<32x256xf32>
    %13 = arith.addf %10, %12 : vector<32x256xf32>
    %c0_12 = arith.constant 0 : index
    %c0_13 = arith.constant 0 : index
    %c0_14 = arith.constant 0 : index
    %14 = vector.load %arg6[%c0_12, %c0_13, %c0_14] : memref<1x32x256xf32, #tpu.memory_space<vmem>>, vector<1x32x256xf32>
    %15 = vector.shape_cast %14 : vector<1x32x256xf32> to vector<32x256xf32>
    %16 = vector.shape_cast %13 : vector<32x256xf32> to vector<1x32x256xf32>
    tpu.vector_store %arg6[%c0_12, %c0_13, %c0_14], %16 {strides = array<i32>} : memref<1x32x256xf32, #tpu.memory_space<vmem>>, vector<1x32x256xf32>,
    return
  }
  func.func @transform_0(%arg0: i32) -> (i32, i32, i32) {
    %c0_i32 = arith.constant 0 : i32
    %c0_i32_0 = arith.constant 0 : i32
    %c0_i32_1 = arith.constant 0 : i32
    return %arg0, %c0_i32, %c0_i32_0 : i32, i32, i32
  }
  func.func @transform_1(%arg0: i32) -> (i32, i32) {
    %c0_i32 = arith.constant 0 : i32
    %c0_i32_0 = arith.constant 0 : i32
    %c0_i32_1 = arith.constant 0 : i32
    return %c0_i32, %c0_i32_0 : i32, i32
  }
  func.func @transform_2(%arg0: i32) -> (i32, i32) {
    %c0_i32 = arith.constant 0 : i32
    %c0_i32_0 = arith.constant 0 : i32
    %c0_i32_1 = arith.constant 0 : i32
    return %c0_i32, %c0_i32_0 : i32, i32
  }
  func.func @transform_3(%arg0: i32) -> (i32, i32) {
    %c0_i32 = arith.constant 0 : i32
    %c0_i32_0 = arith.constant 0 : i32
    %c0_i32_1 = arith.constant 0 : i32
    return %c0_i32, %c0_i32_0 : i32, i32
  }
  func.func @transform_4(%arg0: i32) -> (i32, i32) {
    %c0_i32 = arith.constant 0 : i32
    %c0_i32_0 = arith.constant 0 : i32
    %c0_i32_1 = arith.constant 0 : i32
    return %c0_i32, %c0_i32_0 : i32, i32
  }
  func.func @transform_5(%arg0: i32) -> (i32, i32, i32) {
    %c0_i32 = arith.constant 0 : i32
    %c0_i32_0 = arith.constant 0 : i32
    %c0_i32_1 = arith.constant 0 : i32
    return %arg0, %c0_i32, %c0_i32_0 : i32, i32, i32
  }
}

</mosaic_0001>

<bundles_post_ra>
// kernel: tpu_custom_call.1
= control target key start
LH: loop header
LB: loop body
LE: loop exit
PB: predicated region body
PF: predicated region fallthrough
CT: control target
= control target key end

     0   :  { %10 = vsyncpa [#allocation3], 0  ;;  %s848_s0 = inlined_call_operand.vmem [shape: f32[2,36,256], index: 0, kind: input, shape index: {}]   ;;  %s849_s1 = inlined_call_operand.vmem [shape: f32[4,36], index: 1, kind: input, shape index: {}]   ;;  %s850_s2 = inlined_call_operand.vmem [shape: f32[4,1], index: 2, kind: input, shape index: {}]   ;;  %s851_s3 = inlined_call_operand.vmem [shape: f32[32,4], index: 3, kind: input, shape index: {}]   ;;  %s852_s4 = inlined_call_operand.vmem [shape: f32[32,1], index: 4, kind: input, shape index: {}]   ;;  %s853_s5 = inlined_call_operand.hbm [shape: f32[2,32,256], index: 5, kind: output, shape index: {}]  }
   0x1   :  { %12 = vsyncpa [#allocation3 + $0x1], 0  ;;  %s708_s18 = smov 0   ;;  %s710_s19 = smov 0  }
   0x2   :  { %s712_s20 = smov 0   ;;  %s714_s21 = smov 0  }
   0x3 LB: > { %s729_s22 = sadd.s32 4294967295, %s671_s21   ;;  %s544_s23 = sadd.s32 4294967294, %s671_s21   ;;  %s671_s21 = sphi %s714_s21, %s859_s21   ;;  %s667_s20 = sphi %s712_s20, %s858_s20   ;;  %s663_s19 = sphi %s710_s19, %s857_s19   ;;  %s659_s18 = sphi %s708_s18, %s856_s18  }
   0x4   : > { %s733_s24 = sadd.s32 1, %s671_s21   ;;  %s135_s25 = sadd.s32 1, %s667_s20 }
   0x5   : > { %s132_s26 = ssub.s32 %s671_s21, %s733_s24  ;;  %p145_p0 = scmp.ne.s32.totalorder %s667_s20, %s663_s19 }
   0x6   : > { %p133_p1 = scmp.eq.s32.totalorder %s132_s26, 0  ;;  %p146_p2 = scmp.eq.s32.totalorder %s729_s22, 1 }
   0x7   : > { %p151_p3 = scmp.ne.s32.totalorder %s663_s19, %s659_s18  ;;  %p152_p4 = scmp.eq.s32.totalorder %s544_s23, 1 }
   0x8   : > { %s744_s27 = scalar_select %p133_p1, %s667_s20, %s135_s25  }
   0x9   : > { %p746_p5 = por %p146_p2, %p145_p0  ;;  %p750_p6 = por %p152_p4, %p151_p3 }
   0xa   : > { %p547_p7 = scmp.ge.s32.totalorder %s671_s21, 1  ;;  %p190_p8 = scmp.lt.s32.totalorder %s671_s21, 3 }
   0xc   : > { %p191_p9 = pnand %p547_p7, %p190_p8 }
   0xd   : > { %p218_p10 = scmp.lt.s32.totalorder (!%p191_p9), %s729_s22, 1  ;;  %s215_s14 = sand.u32 (!%p191_p9), 1, %s663_s19  }
   0xe   : > { %194 = sbr.rel (%p191_p9) target bundleno = 459 (0x1cb), region = 40  ;;  %s548_s15 = sshll.u32 (!%p191_p9), %s215_s14, 6 }
   0xf   : > { %s217_s16 = scalar_lea.vmem (!%p191_p9), [#allocation2], %s548_s15  ;;  %s564_s17 = sshll.u32 (!%p191_p9), %s729_s22, 10 }
  0x10   : > { %s482_s23 = sshll.u32 (!%p191_p9), %s217_s16, 4  ;;  %s802_s30 = scalar_lea.hbm (!%p191_p9), %s853_s5, %s564_s17  ;;  %s804_s23 = int_to_ptr.vmem [resolvable:$true] %s482_s23 }
  0x11   : > { %s611_s6 = scalar_lea.vmem (!%p191_p9), %s804_s23, 1024 }
  0x12   : > { %p612_p11 = scmp.ne.s32.totalorder (!%p191_p9), %s804_s23, %s611_s6 }
  0x13   : > { %v673_v0 = vmov 0.0   ;;  %v234_v1 = vld [vmem:[%s850_s2] sm:$0xf]  ;;  %s219_s7 = scalar_select %p218_p10, %s729_s22, 1  ;;  %v674_v2 = vmov 0   ;;  %vm244_vm0 = vcmask 1043456  }
  0x14   : > { %315 = vmatprep.mubr.f32.mxu0 %v673_v0  ;;  %435 = vmatprep.mubr.f32.mxu1 %v673_v0  ;;  %v328_v3 = vld [vmem:[%s852_s4] sm:$0xff]  ;;  %v331_v8 = vld [vmem:[%s852_s4 + $0x18] sm:$0xff]  ;;  %vm240_vm1 = vcmask 293888   ;;  %v329_v16 = vld [vmem:[%s852_s4 + $0x8] sm:$0xff]  ;;  %vm352_vm2 = vcmask 31744   ;;  %s808_s22 = scalar_lea.sflag [#allocation3], %s215_s14  ;;  %p613_p12 = pnand %p612_p11, %p746_p5 }
  0x15   : > { %609 = vset.pattern.permute.xlu0 %v674_v2  ;;  %610 = vset.pattern.permute.xlu1 %v674_v2  ;;  %s565_s8 = smul.u32 80, %s219_s7  ;;  %v223_v15 = vld [vmem:[%s849_s1] sm:$0xf]  ;;  %v330_v17 = vld [vmem:[%s852_s4 + $0x10] sm:$0xff]  ;;  %v325_v26 = vld [vmem:[%s851_s3 + $0x8] sm:$0xff]  ;;  %s675_s7 = smov [#allocation2]  }
  0x16   : > { %237 = vperm.xlu0 %609, %v234_v1   ;;  %339 = vperm.xlu1 %610, %v329_v16   ;;  %v324_v25 = vld [vmem:[%s851_s3] sm:$0xff]  ;;  %v326_v27 = vld [vmem:[%s851_s3 + $0x10] sm:$0xff]  ;;  %v327_v28 = vld [vmem:[%s851_s3 + $0x18] sm:$0xff]  ;;  %p614_p13 = pneg %p613_p12 }
  0x17   : > { %s222_s13 = scalar_lea.vmem %s848_s0, %s565_s8  ;;  %s615_s8 = sshll.u32 %s675_s7, 4  ;;  %s616_s8 = int_to_ptr.vmem [resolvable:$false] %s615_s8 }
  0x18   : > { %v233_v4 = vld [vmem:[%s222_s13 + $0x48] sm:$0xf]  ;;  %v232_v5 = vld [vmem:[%s222_s13 + $0x40] sm:$0xf]  ;;  %v231_v6 = vld [vmem:[%s222_s13 + $0x38] sm:$0xff]  ;;  %s617_s9 = scalar_lea.vmem %s616_s8, 2048  ;;  %p618_p0 = scmp.lt.s32.totalorder %s804_s23, %s616_s8 }
  0x19   : > { %550 = vmatprep.subr.msk.mxu0 %vm244_vm0, %v233_v4  ;;  %v230_v7 = vld [vmem:[%s222_s13 + $0x30] sm:$0xff]  ;;  %v229_v9 = vld [vmem:[%s222_s13 + $0x28] sm:$0xff]  ;;  %v228_v10 = vld [vmem:[%s222_s13 + $0x20] sm:$0xff]  ;;  %p619_p1 = scmp.lt.s32.totalorder %s617_s9, %s611_s6 }
  0x1a   : > { %334 = vperm.xlu0 %609, %v328_v3   ;;  %551 = vmatpush1.msk.msra.mxu0 %vm244_vm0, %v232_v5  ;;  %v227_v11 = vld [vmem:[%s222_s13 + $0x18] sm:$0xff]  ;;  %v226_v12 = vld [vmem:[%s222_s13 + $0x10] sm:$0xff]  ;;  %v225_v13 = vld [vmem:[%s222_s13 + $0x8] sm:$0xff] }
  0x1b   : > { %275 = vmatprep.subr.mxu0 %v231_v6  ;;  %v224_v14 = vld [vmem:[%s222_s13] sm:$0xff]  ;;  %344 = vperm.xlu1 %610, %v330_v17   ;;  %p620_p2 = por %p619_p1, %p618_p0 }
  0x1c   : > { %276 = vmatpush1.msra.mxu0 %v230_v7 }
  0x1d   : > { %277 = vmatprep.subr.mxu0 %v229_v9  ;;  %p621_p3 = pnand %p620_p2, %p614_p13 }
  0x1e   : > { %349 = vperm.xlu0 %609, %v331_v8   ;;  %278 = vmatpush1.msra.mxu0 %v228_v10 }
  0x1f   : > { %279 = vmatprep.subr.mxu0 %v227_v11 }
  0x20   : > { %280 = vmatpush1.msra.mxu0 %v226_v12 }
  0x21   : > { %281 = vmatprep.subr.mxu0 %v225_v13 }
  0x22   : > { %282 = vmatpush1.msra.mxu0 %v224_v14 }
  0x23   : > { %552 = vmatmul.mubr.msk.f32.vlgmr.msra.gmra.mxu0 %vm240_vm1, %v223_v15 }
  0x91   : > { %v238_v19 = vpop.permute.xlu0 %237  ;;  %v340_v31 = vpop.permute.xlu1 %339 }
  0x95   : > { %v335_v29 = vpop.permute.xlu0 %334 }
  0x96   : > { %v345_v38 = vpop.permute.xlu1 %344 }
  0x99   : > { %v350_v44 = vpop.permute.xlu0 %349 }
  0xe3   : > { %v317_v18 = vpop.f32.mrf.mxu0 }
  0xe4   : > { %v318_v20 = vadd.f32 %v317_v18, %v238_v19 }
  0xe5   : > { %v319_v21 = vpop.f32.mrf.mxu0 }
  0xe6   : > { %v320_v22 = vadd.f32 %v319_v21, %v238_v19  ;;  %v322_v24 = vmax.f32 %v318_v20, 0.0 }
  0xe8   : > { %v323_v23 = vmax.f32 %v320_v22, 0.0 }
  0xea   : > { %553 = vmatprep.subr.msk.mxu1 %vm244_vm0, %v323_v23 }
  0xeb   : > { %554 = vmatpush1.msk.msra.mxu1 %vm244_vm0, %v322_v24 }
  0xec   : > { %555 = vmatmul.mubr.msk.f32.vlgmr.msra.gmra.mxu1 %vm352_vm2, %v324_v25 }
  0xed   : > { %441 = vmatprep.mubr.f32.mxu1 %v673_v0 }
  0xf0   : > { %556 = vmatmul.mubr.msk.f32.gmra.mxu1 %vm352_vm2, %v325_v26 }
  0xf1   : > { %447 = vmatprep.mubr.f32.mxu1 %v673_v0 }
  0xf4   : > { %557 = vmatmul.mubr.msk.f32.gmra.mxu1 %vm352_vm2, %v326_v27 }
  0xf5   : > { %453 = vmatprep.mubr.f32.mxu1 %v673_v0 }
  0xf8   : > { %558 = vmatmul.mubr.msk.f32.gmra.mxu1 %vm352_vm2, %v327_v28 }
 0x1ac   : > { %v437_v30 = vpop.f32.mrf.mxu1 }
 0x1ad   : > { %v438_v32 = vadd.f32 %v437_v30, %v335_v29 }
 0x1ae   : > { %v439_v33 = vpop.f32.mrf.mxu1 }
 0x1af   : > { %460 = vst [vmem:[%s217_s16] sm:$0xff] %v438_v32  ;;  %v440_v34 = vadd.f32 %v439_v33, %v335_v29 }
 0x1b0   : > { %v443_v35 = vpop.f32.mrf.mxu1 }
 0x1b1   : > { %461 = vst [vmem:[%s217_s16 + $0x8] sm:$0xff] %v440_v34  ;;  %v444_v36 = vadd.f32 %v443_v35, %v340_v31 }
 0x1b2   : > { %v445_v37 = vpop.f32.mrf.mxu1 }
 0x1b3   : > { %462 = vst [vmem:[%s217_s16 + $0x10] sm:$0xff] %v444_v36  ;;  %v446_v39 = vadd.f32 %v445_v37, %v340_v31 }
 0x1b4   : > { %v449_v40 = vpop.f32.mrf.mxu1 }
 0x1b5   : > { %463 = vst [vmem:[%s217_s16 + $0x18] sm:$0xff] %v446_v39  ;;  %v450_v41 = vadd.f32 %v449_v40, %v345_v38 }
 0x1b6   : > { %v451_v42 = vpop.f32.mrf.mxu1 }
 0x1b7   : > { %464 = vst [vmem:[%s217_s16 + $0x20] sm:$0xff] %v450_v41  ;;  %v452_v43 = vadd.f32 %v451_v42, %v345_v38 }
 0x1b8   : > { %v455_v45 = vpop.f32.mrf.mxu1 }
 0x1b9   : > { %465 = vst [vmem:[%s217_s16 + $0x28] sm:$0xff] %v452_v43  ;;  %v456_v46 = vadd.f32 %v455_v45, %v350_v44 }
 0x1ba   : > { %v457_v47 = vpop.f32.mrf.mxu1 }
 0x1bb   : > { %466 = vst [vmem:[%s217_s16 + $0x30] sm:$0xff] %v456_v46  ;;  %v458_v48 = vadd.f32 %v457_v47, %v350_v44 }
 0x1bd   : > { %467 = vst [vmem:[%s217_s16 + $0x38] sm:$0xff] %v458_v48 }
 0x1be   : > { %624 = shalt.err (!%p621_p3)
}
 0x1bf   : > { %s625_s10 = scalar_lea.hbm %s802_s30, 1024  ;;  %s629_s13 = scalar_lea.hbm %s853_s5, 2048 }
 0x1c0   : > { %p626_p4 = scmp.ne.s32.totalorder %s802_s30, %s625_s10  ;;  %p630_p9 = scmp.lt.s32.totalorder %s802_s30, %s853_s5 }
 0x1c1   : > { %p631_p10 = scmp.lt.s32.totalorder %s629_s13, %s625_s10 }
 0x1c2   : > { %p627_p7 = pnand %p626_p4, %p746_p5 }
 0x1c3   : > { %p632_p11 = por %p631_p10, %p630_p9 }
 0x1c4   : > { %p628_p8 = pneg %p627_p7 }
 0x1c6   : > { %p633_p12 = pnand %p632_p11, %p628_p8 }
 0x1c8   : > { %636 = shalt.err (!%p633_p12)
}
 0x1c9   : > { %s676_s16 = smov 256   ;;  %s677_s17 = smov 16  }
 0x1ca   : > { %566 = dma.vmem_to_hbm [thread:$0]  (%p746_p5), %s804_s23, 1024, %s802_s30, %s808_s22, %s676_s16, %s676_s16, %s677_s17  }
 0x1cb PF: > { %p572_p13 = scmp.ge.s32.totalorder %s671_s21, 2  ;;  %s497_s25 = sand.u32 1, %s659_s18  }
 0x1cc   : > { %s498_s26 = scalar_lea.sflag [#allocation3], %s497_s25 }
 0x1cd   : > { %p569_p0 = pnand %p572_p13, %p750_p6 }
 0x1cf   : > { %p570_p1 = pneg %p569_p0 }
 0x1d1   : > { %654 = dma.done.wait (%p570_p1), %s498_s26, 1024  }
 0x1d2   : > { %656 = vsyncadd (%p570_p1), %s498_s26, 4294966272  ;;  %p15_p2 = scmp.ge.s32.totalorder %s733_s24, 4   ;;  %s856_s18 = smov %s663_s19 }
 0x1d3   : > { %s857_s19 = smov %s667_s20  ;;  %s858_s20 = smov %s744_s27 }
 0x1d4   : > { %s859_s21 = smov %s733_s24  ;;  %17 = sbr.rel (!%p15_p2) target bundleno = 3 (0x3), region = 75 }
 0x1d9   :  { %503 = vsyncpa [#allocation3], 1 }
 0x1da   :  { %505 = vsyncpa [#allocation3 + $0x1], 1 }

</bundles_post_ra>
